<compile_context>
chip_gen: v5e
topology: v5e:2x2
jax: 0.10.0
libtpu: 0.0.40
codegen_flags: <defaults>
</compile_context>

<pallas_src>
import functools

import jax
import jax.numpy as jnp
from jax import lax
from jax.experimental import pallas as pl
from jax.experimental.pallas import tpu as pltpu

_LANES = 128                       # lane width (last dim)
_ACC_ROWS = 8                      # sublanes of one f32 vreg -> accumulator (8, 128)
_CHUNK_ROWS = 1024                 # in-kernel compute chunk (bounds temporaries ~0.5 MiB)
_TARGET_BLOCK_BYTES = 4 << 20      # ~4 MiB of input per block per operand


def _sublane_multiple(dtype):
    """Sublane tile multiple for a dtype: f32->8, bf16/f16->16, int8/fp8->32."""
    item = jnp.dtype(dtype).itemsize
    return max(8, 32 // max(int(item), 1))


def _is_multicore_chip():
    """Best-effort: True if the chip has >1 TensorCore (v4 / v5p / v7x)."""
    try:
        kind = jax.devices()[0].device_kind.lower()
    except Exception:
        return False
    return any(tag in kind for tag in ("v4", "v5p", "v7", "7x"))


def _mse_kernel(yt_ref, yp_ref, out_ref, acc_ref, *,
                masked, val_exclude, block_rows, valid_rows, need_mask):
    c = pl.program_id(0)               # core-split axis ("parallel")
    i = pl.program_id(1)               # reduction axis ("arbitrary")

    @pl.when(i == 0)
    def _init():
        acc_ref[...] = jnp.zeros_like(acc_ref)

    chunk = min(_CHUNK_ROWS, block_rows)
    n_chunks = block_rows // chunk     # wrapper guarantees block_rows % chunk == 0
    # Global starting row of this block, computed from the UN-clamped grid indices so
    # that a clamped duplicate block (uneven core split) gets row0 >= valid_rows and
    # is therefore fully zeroed by the tail mask.
    row0_block = (c * pl.num_programs(1) + i) * block_rows

    def partial_sum(off, apply_tail_mask):
        # Cast on the VPU; inputs arrive in their native dtype.
        yt = yt_ref[pl.ds(off, chunk), :].astype(jnp.float32)
        yp = yp_ref[pl.ds(off, chunk), :].astype(jnp.float32)
        d = yp - yt
        sq = d * d
        if masked:
            # compute_vec_masked: zero contributions where y_true == val_exclude.
            sq = jnp.where(yt == jnp.float32(val_exclude), jnp.float32(0.0), sq)
        if apply_tail_mask:
            # Zero rows past the logical end of the data (partial trailing block or a
            # fully-masked duplicate clamped block).  NaN-safe for garbage OOB rows.
            local = lax.broadcasted_iota(jnp.int32, (chunk, _LANES), 0)
            sq = jnp.where(local < (valid_rows - (row0_block + off)), sq,
                           jnp.float32(0.0))
        # Pure-VPU fold onto a single (8, 128) vreg.
        return sq.reshape(chunk // _ACC_ROWS, _ACC_ROWS, _LANES).sum(axis=0)

    def run(apply_tail_mask):
        if n_chunks == 1:
            acc_ref[...] += partial_sum(0, apply_tail_mask)
        else:
            def body(ci, carry):
                off = pl.multiple_of(ci * chunk, chunk)
                return carry + partial_sum(off, apply_tail_mask)
            acc_ref[...] += lax.fori_loop(
                0, n_chunks, body, jnp.zeros((_ACC_ROWS, _LANES), jnp.float32))

    if need_mask:
        # Fast path for interior blocks; only the block crossing the end of the valid
        # row range (or a duplicate clamped block) pays the iota+compare+select.
        @pl.when(row0_block + block_rows <= valid_rows)
        def _full():
            run(False)

        @pl.when(row0_block + block_rows > valid_rows)
        def _tail():
            run(True)
    else:
        run(False)

    @pl.when(i == pl.num_programs(1) - 1)
    def _finalize():
        out_ref[...] = acc_ref[...]    # dump per-core partial sums (lane-dense)


def _mse_jnp(yt_flat, yp_flat, n, is_masks_exclude, val_exclude):
    """Tiny-input fallback (fewer than one sublane tile of complete rows)."""
    yt = yt_flat.astype(jnp.float32)
    yp = yp_flat.astype(jnp.float32)
    sq = jnp.square(yp - yt)
    if is_masks_exclude:
        sq = jnp.where(yt == jnp.float32(val_exclude), jnp.float32(0.0), sq)
    return jnp.sum(sq) / jnp.float32(n)


def mean_squared(y_true, y_pred, *, is_masks_exclude=False, val_exclude=-1.0):
    """MSE metric (MeanSquared.forward). Accepts arbitrary matching shapes, e.g. NCHW."""
    assert y_true.shape == y_pred.shape, "y_true / y_pred shape mismatch"
    n = int(y_true.size)
    if n == 0:
        return jnp.float32(0.0)

    yt_flat = jnp.ravel(y_true)   # reshape of a contiguous array: free bitcast
    yp_flat = jnp.ravel(y_pred)

    sub = max(_sublane_multiple(y_true.dtype), _sublane_multiple(y_pred.dtype))
    rows = n // _LANES            # complete 128-lane rows (kernel head)
    tail_n = n - rows * _LANES    # <128-element ragged tail (wrapper-side)

    if rows < sub:                # too small for a single sublane tile -> plain jnp
        return _mse_jnp(yt_flat, yp_flat, n, is_masks_exclude, val_exclude)

    head_n = rows * _LANES
    if tail_n:
        # Only the 128-aligned head goes through the kernel; no full-array jnp.pad.
        yt2 = yt_flat[:head_n].reshape(rows, _LANES)
        yp2 = yp_flat[:head_n].reshape(rows, _LANES)
    else:
        yt2 = yt_flat.reshape(rows, _LANES)   # free bitcast, zero extra HBM traffic
        yp2 = yp_flat.reshape(rows, _LANES)

    # Block sizing: keep ~4 MiB of the widest input dtype per block per operand
    # (8192 rows for f32, 16384 for bf16, ...), rounded to the in-kernel chunk.
    max_item = max(jnp.dtype(y_true.dtype).itemsize, jnp.dtype(y_pred.dtype).itemsize)
    max_block_rows = max(
        _CHUNK_ROWS,
        (_TARGET_BLOCK_BYTES // (_LANES * max_item)) // _CHUNK_ROWS * _CHUNK_ROWS)
    if rows >= max_block_rows:
        block_rows = max_block_rows
    elif rows >= _CHUNK_ROWS:
        block_rows = (rows // _CHUNK_ROWS) * _CHUNK_ROWS
    else:
        block_rows = (rows // sub) * sub      # >= sub, multiple of the dtype tile

    total_tiles = pl.cdiv(rows, block_rows)
    # 2-way "parallel" split only where it maps to real hardware (2 TensorCores).
    num_splits = 2 if (_is_multicore_chip() and total_tiles >= 2) else 1
    inner = pl.cdiv(total_tiles, num_splits)
    need_mask = (num_splits * inner * block_rows != rows)
    last_tile = total_tiles - 1

    def in_index(c, i):
        # Clamp so no DMA window starts past the array; clamped duplicate blocks are
        # fully zeroed in-kernel (their un-clamped row0 >= valid_rows).
        return (jnp.minimum(c * inner + i, last_tile), 0)

    kernel = functools.partial(
        _mse_kernel,
        masked=bool(is_masks_exclude),
        val_exclude=float(val_exclude),
        block_rows=int(block_rows),
        valid_rows=int(rows),
        need_mask=bool(need_mask),
    )

    bytes_in = head_n * (jnp.dtype(y_true.dtype).itemsize
                         + jnp.dtype(y_pred.dtype).itemsize)
    cost = pl.CostEstimate(
        flops=3 * head_n,                                     # sub + mul + add
        transcendentals=0,
        bytes_accessed=bytes_in + num_splits * _ACC_ROWS * _LANES * 4,
    )

    partials = pl.pallas_call(
        kernel,
        out_shape=jax.ShapeDtypeStruct((num_splits * _ACC_ROWS, _LANES), jnp.float32),
        grid_spec=pltpu.PrefetchScalarGridSpec(
            num_scalar_prefetch=0,
            grid=(num_splits, inner),
            in_specs=[
                pl.BlockSpec((block_rows, _LANES), in_index),
                pl.BlockSpec((block_rows, _LANES), in_index),
            ],
            out_specs=pl.BlockSpec((_ACC_ROWS, _LANES), lambda c, i: (c, 0)),
            scratch_shapes=[pltpu.VMEM((_ACC_ROWS, _LANES), jnp.float32)],
        ),
        compiler_params=pltpu.CompilerParams(
            dimension_semantics=("parallel", "arbitrary"),
            vmem_limit_bytes=32 * 1024 * 1024,
        ),
        cost_estimate=cost,
    )(yt2, yp2)

    total = jnp.sum(partials)   # tiny final tree-reduce of per-core (8,128) partials

    if tail_n:
        # Fold the <128-element ragged tail with plain jnp (negligible work).
        tt = yt_flat[head_n:].astype(jnp.float32)
        tp = yp_flat[head_n:].astype(jnp.float32)
        tsq = jnp.square(tp - tt)
        if is_masks_exclude:
            tsq = jnp.where(tt == jnp.float32(val_exclude), jnp.float32(0.0), tsq)
        total = total + jnp.sum(tsq)

    # Divide by the TRUE element count: matches torch.mean over all elements.
    return total / jnp.float32(n)


class MeanSquared:
    """Thin functional mirror of Networks_Pytorch.Metrics.MeanSquared."""
    val_exclude = -1.0

    def __init__(self, is_masks_exclude=False):
        self.is_masks_exclude = is_masks_exclude
        self.name_fun_out = "mean_squared"

    def forward(self, y_true, y_pred):
        return mean_squared(y_true, y_pred,
                            is_masks_exclude=self.is_masks_exclude,
                            val_exclude=self.val_exclude)

    __call__ = forward
    loss = forward
    mean_squared = forward


if __name__ == "__main__":
    key = jax.random.PRNGKey(0)
    k1, k2, k3, k4 = jax.random.split(key, 4)

    # Primary: NCHW, small (matches the PyTorch conv convention used upstream).
    y_true = jax.random.uniform(k1, (2, 4, 16, 16), dtype=jnp.float32)
    y_pred = jax.random.uniform(k2, (2, 4, 16, 16), dtype=jnp.float32)

    res = jax.block_until_ready(MeanSquared()(y_true, y_pred))
    ref = jnp.mean(jnp.square(y_pred - y_true))
    assert jnp.allclose(res, ref, rtol=1e-5, atol=1e-6), (res, ref)

    # Masked variant (compute_vec_masked semantics).
    y_true_m = y_true.at[0, 0, 0, :].set(-1.0)
    res_m = jax.block_until_ready(
        MeanSquared(is_masks_exclude=True)(y_true_m, y_pred))
    mask = jnp.where(y_true_m == -1.0, 0.0, 1.0)
    ref_m = jnp.mean(jnp.square(y_pred - y_true_m) * mask)
    assert jnp.allclose(res_m, ref_m, rtol=1e-5, atol=1e-6), (res_m, ref_m)

    # Ragged size: exercises the head/tail split, multi-block grid and the gated
    # in-kernel tail-row masking.
    yt_b = jax.random.uniform(k3, (2, 3, 250, 200), dtype=jnp.float32)
    yp_b = jax.random.uniform(k4, (2, 3, 250, 200), dtype=jnp.float32)
    res_b = jax.block_until_ready(mean_squared(yt_b, yp_b))
    ref_b = jnp.mean(jnp.square(yp_b - yt_b))
    assert jnp.allclose(res_b, ref_b, rtol=1e-4, atol=1e-6), (res_b, ref_b)

    # 128-aligned but uneven tile count: partial trailing block (and duplicate
    # clamped block when the 2-way core split is active).
    yt_c = jax.random.uniform(k1, (2, 2, 1025, 128), dtype=jnp.float32)
    yp_c = jax.random.uniform(k2, (2, 2, 1025, 128), dtype=jnp.float32)
    res_c = jax.block_until_ready(mean_squared(yt_c, yp_c))
    ref_c = jnp.mean(jnp.square(yp_c - yt_c))
    assert jnp.allclose(res_c, ref_c, rtol=1e-4, atol=1e-6), (res_c, ref_c)

    print("KERNEL_OK")
</pallas_src>

<mosaic_0001>
module attributes {stable_mosaic.version = 11 : i64} {
  func.func @_mse_kernel(%arg0: i32, %arg1: i32, %arg2: memref<16x128xf32, #tpu.memory_space<vmem>>, %arg3: memref<16x128xf32, #tpu.memory_space<vmem>>, %arg4: memref<8x128xf32, #tpu.memory_space<vmem>>, %arg5: memref<8x128xf32, #tpu.memory_space<vmem>>) attributes {dimension_semantics = [#tpu.dimension_semantics<parallel>, #tpu.dimension_semantics<arbitrary>], iteration_bounds = array<i64: 1, 1>, scalar_prefetch = 0 : i64, scratch_operands = 1 : i64, tpu.core_type = #tpu.core_type<tc>, window_params = [{transform_indices = @transform_0, window_bounds = array<i64: 16, 128>}, {transform_indices = @transform_1, window_bounds = array<i64: 16, 128>}, {transform_indices = @transform_2, window_bounds = array<i64: 8, 128>}]} {
    %c0_i32 = arith.constant 0 : i32
    %0 = arith.cmpi eq, %arg1, %c0_i32 : i32
    %1 = arith.extui %0 : i1 to i32
    %c0_i32_0 = arith.constant 0 : i32
    %2 = arith.cmpi ne, %1, %c0_i32_0 : i32
    scf.if %2 {
      %cst_10 = arith.constant 0.000000e+00 : f32
      %15 = vector.broadcast %cst_10 : f32 to vector<8x128xf32>
      %c0_11 = arith.constant 0 : index
      %c0_12 = arith.constant 0 : index
      %16 = vector.load %arg5[%c0_11, %c0_12] : memref<8x128xf32, #tpu.memory_space<vmem>>, vector<8x128xf32>
      tpu.vector_store %arg5[%c0_11, %c0_12], %15 {strides = array<i32>} : memref<8x128xf32, #tpu.memory_space<vmem>>, vector<8x128xf32>,
    } else {
    }
    %c0 = arith.constant 0 : index
    %c0_1 = arith.constant 0 : index
    %3 = vector.load %arg5[%c0, %c0_1] : memref<8x128xf32, #tpu.memory_space<vmem>>, vector<8x128xf32>
    %c0_2 = arith.constant 0 : index
    %c0_3 = arith.constant 0 : index
    %4 = vector.load %arg2[%c0_2, %c0_3] : memref<16x128xf32, #tpu.memory_space<vmem>>, vector<16x128xf32>
    %c0_4 = arith.constant 0 : index
    %c0_5 = arith.constant 0 : index
    %5 = vector.load %arg3[%c0_4, %c0_5] : memref<16x128xf32, #tpu.memory_space<vmem>>, vector<16x128xf32>
    %6 = arith.subf %5, %4 : vector<16x128xf32>
    %7 = arith.mulf %6, %6 : vector<16x128xf32>
    %8 = vector.shape_cast %7 : vector<16x128xf32> to vector<2x8x128xf32>
    %cst = arith.constant dense<0.000000e+00> : vector<8x128xf32>
    %9 = vector.multi_reduction <add>, %8, %cst [0] : vector<2x8x128xf32> to vector<8x128xf32>
    %10 = arith.addf %3, %9 : vector<8x128xf32>
    %c0_6 = arith.constant 0 : index
    %c0_7 = arith.constant 0 : index
    %11 = vector.load %arg5[%c0_6, %c0_7] : memref<8x128xf32, #tpu.memory_space<vmem>>, vector<8x128xf32>
    tpu.vector_store %arg5[%c0_6, %c0_7], %10 {strides = array<i32>} : memref<8x128xf32, #tpu.memory_space<vmem>>, vector<8x128xf32>,
    %c0_i32_8 = arith.constant 0 : i32
    %12 = arith.cmpi eq, %arg1, %c0_i32_8 : i32
    %13 = arith.extui %12 : i1 to i32
    %c0_i32_9 = arith.constant 0 : i32
    %14 = arith.cmpi ne, %13, %c0_i32_9 : i32
    scf.if %14 {
      %c0_10 = arith.constant 0 : index
      %c0_11 = arith.constant 0 : index
      %15 = vector.load %arg5[%c0_10, %c0_11] : memref<8x128xf32, #tpu.memory_space<vmem>>, vector<8x128xf32>
      %c0_12 = arith.constant 0 : index
      %c0_13 = arith.constant 0 : index
      %16 = vector.load %arg4[%c0_12, %c0_13] : memref<8x128xf32, #tpu.memory_space<vmem>>, vector<8x128xf32>
      tpu.vector_store %arg4[%c0_12, %c0_13], %15 {strides = array<i32>} : memref<8x128xf32, #tpu.memory_space<vmem>>, vector<8x128xf32>,
    } else {
    }
    return
  }
  func.func @transform_0(%arg0: i32, %arg1: i32) -> (i32, i32) {
    %c1_i32 = arith.constant 1 : i32
    %0 = arith.muli %arg0, %c1_i32 : i32
    %1 = arith.addi %0, %arg1 : i32
    %c0_i32 = arith.constant 0 : i32
    %2 = arith.minsi %1, %c0_i32 : i32
    %c0_i32_0 = arith.constant 0 : i32
    %c0_i32_1 = arith.constant 0 : i32
    return %2, %c0_i32_0 : i32, i32
  }
  func.func @transform_1(%arg0: i32, %arg1: i32) -> (i32, i32) {
    %c1_i32 = arith.constant 1 : i32
    %0 = arith.muli %arg0, %c1_i32 : i32
    %1 = arith.addi %0, %arg1 : i32
    %c0_i32 = arith.constant 0 : i32
    %2 = arith.minsi %1, %c0_i32 : i32
    %c0_i32_0 = arith.constant 0 : i32
    %c0_i32_1 = arith.constant 0 : i32
    return %2, %c0_i32_0 : i32, i32
  }
  func.func @transform_2(%arg0: i32, %arg1: i32) -> (i32, i32) {
    %c0_i32 = arith.constant 0 : i32
    %c0_i32_0 = arith.constant 0 : i32
    return %arg0, %c0_i32 : i32, i32
  }
}

</mosaic_0001>

<bundles_post_ra>
// kernel: tpu_custom_call.1
= control target key start
LH: loop header
LB: loop body
LE: loop exit
PB: predicated region body
PF: predicated region fallthrough
CT: control target
= control target key end

     0   :  { %7 = vsyncpa [#allocation4], 0  ;;  %s220_s0 = inlined_call_operand.hbm [shape: f32[16,128], index: 0, kind: input, shape index: {}]   ;;  %s221_s1 = inlined_call_operand.hbm [shape: f32[16,128], index: 1, kind: input, shape index: {}]   ;;  %s222_s2 = inlined_call_operand.hbm [shape: f32[8,128], index: 2, kind: output, shape index: {}]  }
   0x1   :  { %8 = vsyncpa [#allocation7], 0 }
   0x2   :  { %9 = vsyncpa [#allocation5], 0  ;;  %s20_s11 = sshll.u32 %s220_s0, 4  ;;  %s191_s12 = smov [#allocation3]   ;;  %s21_s11 = int_to_ptr.hbm [resolvable:$true] %s20_s11 }
   0x3   :  { %s22_s13 = sshll.u32 %s191_s12, 4  ;;  %s39_s16 = sshll.u32 %s221_s1, 4  ;;  %s23_s13 = int_to_ptr.vmem [resolvable:$true] %s22_s13  ;;  %s40_s16 = int_to_ptr.hbm [resolvable:$true] %s39_s16 }
   0x4   :  { %s192_s17 = smov 128   ;;  %s193_s18 = smov 8  }
   0x5   :  { %28 = dma.hbm_to_vmem [thread:$0]  %s21_s11, 256, %s23_s13, [#allocation4], %s192_s17, %s192_s17, %s193_s18  }
   0x6   :  { %s194_s19 = smov [#allocation6]  }
   0x7   :  { %s41_s20 = sshll.u32 %s194_s19, 4  ;;  %s42_s20 = int_to_ptr.vmem [resolvable:$true] %s41_s20 }
   0x8   :  { %47 = dma.hbm_to_vmem [thread:$0]  %s40_s16, 256, %s42_s20, [#allocation7], %s192_s17, %s192_s17, %s193_s18  }
   0x9   :  { %185 = dma.done.wait [#allocation4], 256  }
   0xa   :  { %186 = vsyncadd [#allocation4], 4294967040 }
   0xb   :  { %187 = dma.done.wait [#allocation7], 256  }
   0xc   :  { %188 = vsyncadd [#allocation7], 4294967040  ;;  %v70_v0 = vld [vmem:[#allocation3] sm:$0xff]  ;;  %v71_v1 = vld [vmem:[#allocation3 + $0x8] sm:$0xff]  ;;  %s195_s0 = smov [#allocation8]   ;;  %s93_s23 = sshll.u32 %s222_s2, 4  ;;  %s94_s23 = int_to_ptr.hbm [resolvable:$true] %s93_s23 }
   0xd   :  { %v72_v2 = vld [vmem:[#allocation6] sm:$0xff]  ;;  %v73_v3 = vld [vmem:[#allocation6 + $0x8] sm:$0xff]  ;;  %s91_s1 = sshll.u32 %s195_s0, 4  ;;  %s92_s1 = int_to_ptr.vmem [resolvable:$true] %s91_s1 }
   0xe   :  { %v74_v4 = vsub.f32 %v72_v2, %v70_v0  ;;  %v75_v5 = vsub.f32 %v73_v3, %v71_v1 }
  0x10   :  { %v76_v6 = vmul.f32 %v74_v4, %v74_v4  ;;  %v77_v7 = vmul.f32 %v75_v5, %v75_v5 }
  0x12   :  { %v78_v8 = vadd.f32 %v77_v7, %v76_v6 }
  0x14   :  { %85 = vst [vmem:[#allocation8] sm:$0xff] %v78_v8 }
  0x15   :  { %96 = dma.vmem_to_hbm [thread:$0]  %s92_s1, 128, %s94_s23, [#allocation5]  }
  0x16   :  { %189 = dma.done.wait [#allocation5], 128  }
  0x17   :  { %190 = vsyncadd [#allocation5], 4294967168 }
  0x18   :  { %101 = vsyncpa [#allocation4], 1 }
  0x19   :  { %102 = vsyncpa [#allocation7], 1 }
  0x1a   :  { %103 = vsyncpa [#allocation5], 1 }

</bundles_post_ra>
